<compile_context>
chip_gen: v7x
topology: tpu7x:2x2x1
jax: 0.10.0
libtpu: 0.0.40
codegen_flags: <defaults>
</compile_context>

<pallas_src>
import math

import jax
import jax.numpy as jnp
from jax import lax
from jax.experimental import pallas as pl
from jax.experimental.pallas import tpu as pltpu

HIDDEN = 256
LN_EPS = 1e-5
LEAKY_SLOPE = 0.01   # F.leaky_relu default


def _round_up(x, m):
    return (x + m - 1) // m * m


def _cdiv(a, b):
    return (a + b - 1) // b


def _default_elementwise_bf16():
    """bf16 elementwise math on chips with a bf16 VPU (v6e/v7x); f32 on v5e."""
    try:
        kind = jax.devices()[0].device_kind.lower()
    except Exception:
        return True
    return "v5" not in kind


def _make_actor_kernel(elementwise_bf16):
    ew = jnp.bfloat16 if elementwise_bf16 else jnp.float32

    def ln_lrelu(h, g, be):
        # f32 reductions + rsqrt (EUP); normalize/affine/leaky_relu in `ew`.
        mu = jnp.mean(h, axis=-1, keepdims=True)
        xc = h - mu                                        # bound once
        var = jnp.mean(xc * xc, axis=-1, keepdims=True)
        inv = lax.rsqrt(var + LN_EPS)                      # [Bt, 1] f32
        y = (xc * inv).astype(ew) * g.astype(ew) + be.astype(ew)
        return jnp.maximum(y, LEAKY_SLOPE * y)             # mul + max

    def kernel(scale_ref, x_ref, w1_ref, w2_ref, w3_ref, ln_ref, b3_ref, out_ref):
        """One batch tile: fc1+ln1+lrelu -> fc2+ln2+lrelu -> fc_out -> tanh*scale."""
        max_action = scale_ref[0]              # SMEM scalar (prefetched)

        ln = ln_ref[...]                       # [6, 256] f32: b1, g1, be1, b2, g2, be2
        b1, g1, be1 = ln[0:1, :], ln[1:2, :], ln[2:3, :]
        b2, g2, be2 = ln[3:4, :], ln[4:5, :], ln[5:6, :]

        # MXU matmuls: bf16 operands, f32 accumulation.
        h = jnp.dot(x_ref[...].astype(jnp.bfloat16), w1_ref[...],
                    preferred_element_type=jnp.float32) + b1
        h = ln_lrelu(h, g1, be1)

        h = jnp.dot(h.astype(jnp.bfloat16), w2_ref[...],
                    preferred_element_type=jnp.float32) + b2
        h = ln_lrelu(h, g2, be2)

        o = jnp.dot(h.astype(jnp.bfloat16), w3_ref[...],
                    preferred_element_type=jnp.float32) + b3_ref[...]
        out_ref[...] = (max_action * jnp.tanh(o)).astype(out_ref.dtype)

    return kernel


def pack_actor_params(params):
    """One-time host-side prep: bf16 weights, packed LN/bias vectors."""
    action_dim = params["w3"].shape[1]
    ln_pack = jnp.concatenate(
        [params["b1"], params["g1"], params["be1"],
         params["b2"], params["g2"], params["be2"]], axis=0).astype(jnp.float32)
    return {
        "w1": params["w1"].astype(jnp.bfloat16),
        "w2": params["w2"].astype(jnp.bfloat16),
        "w3": params["w3"].astype(jnp.bfloat16),   # [256, action_dim], no lane padding
        "ln": ln_pack,                             # [6, 256] f32
        "b3": params["b3"].astype(jnp.float32),    # [1, action_dim]
        "action_dim": action_dim,
    }


def _pick_b_tile(B):
    if B <= 256:
        # Small inference batches: single grid step, pad only to a sublane multiple.
        return max(8, _round_up(B, 8))
    # Large batches: >= 2 grid steps (v7x megacore + x/out DMA pipelining),
    # ~256-512 row tiles amortize the ~0.35us/step overhead with little pad waste.
    n_steps = max(2, _cdiv(B, 512))
    return _round_up(_cdiv(B, n_steps), 8)


def actor_forward(x, packed, max_action=2.0, b_tile=None, elementwise_bf16=None):
    """x: [B, state_dim] f32 -> [B, action_dim] f32."""
    B, state_dim = x.shape
    action_dim = packed["action_dim"]

    if elementwise_bf16 is None:
        elementwise_bf16 = _default_elementwise_bf16()
    if b_tile is None:
        b_tile = _pick_b_tile(B)
    b_pad = _round_up(B, b_tile)
    if b_pad != B:
        x = jnp.pad(x, ((0, b_pad - B), (0, 0)))

    scale = jnp.full((1,), max_action, dtype=jnp.float32)
    resident = lambda i, s: (0, 0)   # constant index_map -> block stays resident in VMEM

    grid_spec = pltpu.PrefetchScalarGridSpec(
        num_scalar_prefetch=1,           # max_action -> SMEM
        grid=(b_pad // b_tile,),
        in_specs=[
            pl.BlockSpec((b_tile, state_dim), lambda i, s: (i, 0)),   # x tile
            pl.BlockSpec((state_dim, HIDDEN), resident),              # w1 (bf16)
            pl.BlockSpec((HIDDEN, HIDDEN), resident),                 # w2 (bf16)
            pl.BlockSpec((HIDDEN, action_dim), resident),             # w3 (bf16)
            pl.BlockSpec((6, HIDDEN), resident),                      # LN/bias pack
            pl.BlockSpec((1, action_dim), resident),                  # b3
        ],
        out_specs=pl.BlockSpec((b_tile, action_dim), lambda i, s: (i, 0)),
    )

    weight_bytes = (state_dim * HIDDEN + HIDDEN * HIDDEN + HIDDEN * action_dim) * 2 \
        + (6 * HIDDEN + action_dim) * 4
    cost = pl.CostEstimate(
        flops=2 * b_pad * HIDDEN * (state_dim + HIDDEN + action_dim),
        transcendentals=b_pad * (action_dim + 2),
        bytes_accessed=b_pad * (state_dim + action_dim) * 4 + weight_bytes,
    )

    out = pl.pallas_call(
        _make_actor_kernel(elementwise_bf16),
        out_shape=jax.ShapeDtypeStruct((b_pad, action_dim), jnp.float32),
        grid_spec=grid_spec,
        compiler_params=pltpu.CompilerParams(
            dimension_semantics=("parallel",),
        ),
        cost_estimate=cost,
    )(scale, x, packed["w1"], packed["w2"], packed["w3"], packed["ln"], packed["b3"])

    return out if b_pad == B else out[:B]


def init_actor_params(key, state_dim, action_dim):
    """Deterministic synthetic init mirroring Actor._init_weights shapes/semantics."""
    k1, k2, k3, k4 = jax.random.split(key, 4)

    def kaiming_normal(k, fan_in, fan_out, a=0.01):
        gain = math.sqrt(2.0 / (1.0 + a * a))
        std = gain / math.sqrt(fan_in)
        # stored as [in, out] (transpose of PyTorch's [out, in])
        return std * jax.random.normal(k, (fan_in, fan_out), dtype=jnp.float32)

    return {
        "w1": kaiming_normal(k1, state_dim, HIDDEN),
        "b1": jnp.zeros((1, HIDDEN), jnp.float32),
        "g1": jnp.ones((1, HIDDEN), jnp.float32),
        "be1": jnp.zeros((1, HIDDEN), jnp.float32),
        "w2": kaiming_normal(k2, HIDDEN, HIDDEN),
        "b2": jnp.zeros((1, HIDDEN), jnp.float32),
        "g2": jnp.ones((1, HIDDEN), jnp.float32),
        "be2": jnp.zeros((1, HIDDEN), jnp.float32),
        "w3": jax.random.uniform(k3, (HIDDEN, action_dim), jnp.float32, -0.003, 0.003),
        "b3": jax.random.uniform(k4, (1, action_dim), jnp.float32, -0.003, 0.003),
    }


def _leaky_relu_f32(x):
    return jnp.maximum(x, LEAKY_SLOPE * x)


def _layernorm_f32(x, gamma, beta):
    mu = jnp.mean(x, axis=-1, keepdims=True)
    xc = x - mu
    var = jnp.mean(xc * xc, axis=-1, keepdims=True)
    return xc * lax.rsqrt(var + LN_EPS) * gamma + beta


def actor_forward_ref_f32(x, params, max_action=2.0):
    """Pure-f32 JAX reference (matches the PyTorch module)."""
    h = x @ params["w1"] + params["b1"]
    h = _leaky_relu_f32(_layernorm_f32(h, params["g1"], params["be1"]))
    h = h @ params["w2"] + params["b2"]
    h = _leaky_relu_f32(_layernorm_f32(h, params["g2"], params["be2"]))
    o = h @ params["w3"] + params["b3"]
    return max_action * jnp.tanh(o)


def actor_forward_ref_mirror(x, params, max_action=2.0, elementwise_bf16=True):
    """Reference mirroring the kernel's dtype policy."""
    ew = jnp.bfloat16 if elementwise_bf16 else jnp.float32

    def mm(a, w):
        return jnp.dot(a.astype(jnp.bfloat16), w.astype(jnp.bfloat16),
                       preferred_element_type=jnp.float32)

    def ln_lrelu(h, g, be):
        mu = jnp.mean(h, axis=-1, keepdims=True)
        xc = h - mu
        var = jnp.mean(xc * xc, axis=-1, keepdims=True)
        inv = lax.rsqrt(var + LN_EPS)
        y = (xc * inv).astype(ew) * g.astype(ew) + be.astype(ew)
        return jnp.maximum(y, LEAKY_SLOPE * y)

    h = mm(x, params["w1"]) + params["b1"]
    h = ln_lrelu(h, params["g1"], params["be1"])
    h = mm(h, params["w2"]) + params["b2"]
    h = ln_lrelu(h, params["g2"], params["be2"])
    o = mm(h, params["w3"]) + params["b3"]
    return max_action * jnp.tanh(o)


if __name__ == "__main__":
    key = jax.random.PRNGKey(0)
    kx, kp = jax.random.split(key)

    batch, state_dim, action_dim = 8, 16, 4
    max_action = 2.0

    x = jax.random.normal(kx, (batch, state_dim), dtype=jnp.float32)
    params = init_actor_params(kp, state_dim, action_dim)
    packed = pack_actor_params(params)

    ew_flag = _default_elementwise_bf16()

    out = actor_forward(x, packed, max_action=max_action, elementwise_bf16=ew_flag)
    out = jax.block_until_ready(out)
    assert out.shape == (batch, action_dim)

    ref_mirror = actor_forward_ref_mirror(x, params, max_action=max_action,
                                          elementwise_bf16=ew_flag)
    ref_f32 = actor_forward_ref_f32(x, params, max_action=max_action)
    assert jnp.allclose(out, ref_mirror, atol=5e-3, rtol=1e-2), float(
        jnp.max(jnp.abs(out - ref_mirror)))
    assert jnp.allclose(out, ref_f32, atol=2e-2, rtol=2e-2), float(
        jnp.max(jnp.abs(out - ref_f32)))

    # TODO(synk): Adam optimizer state/updates and get_action exploration noise are
    # host-side / training concerns, not part of the fused forward kernel.
    print("KERNEL_OK")
</pallas_src>

<mosaic_0001>
module attributes {stable_mosaic.version = 11 : i64} {
  func.func @kernel(%arg0: i32, %arg1: memref<1xf32, #tpu.memory_space<smem>>, %arg2: memref<8x16xf32, #tpu.memory_space<vmem>>, %arg3: memref<16x256xbf16, #tpu.memory_space<vmem>>, %arg4: memref<256x256xbf16, #tpu.memory_space<vmem>>, %arg5: memref<256x4xbf16, #tpu.memory_space<vmem>>, %arg6: memref<6x256xf32, #tpu.memory_space<vmem>>, %arg7: memref<1x4xf32, #tpu.memory_space<vmem>>, %arg8: memref<8x4xf32, #tpu.memory_space<vmem>>) attributes {dimension_semantics = [#tpu.dimension_semantics<parallel>], iteration_bounds = array<i64: 1>, scalar_prefetch = 1 : i64, scratch_operands = 0 : i64, tpu.core_type = #tpu.core_type<tc>, window_params = [{transform_indices = @transform_0, window_bounds = array<i64: 8, 16>}, {pipeline_mode = #tpu.pipeline_mode<synchronous>, transform_indices = @transform_1, window_bounds = array<i64: 16, 256>}, {pipeline_mode = #tpu.pipeline_mode<synchronous>, transform_indices = @transform_2, window_bounds = array<i64: 256, 256>}, {pipeline_mode = #tpu.pipeline_mode<synchronous>, transform_indices = @transform_3, window_bounds = array<i64: 256, 4>}, {pipeline_mode = #tpu.pipeline_mode<synchronous>, transform_indices = @transform_4, window_bounds = array<i64: 6, 256>}, {pipeline_mode = #tpu.pipeline_mode<synchronous>, transform_indices = @transform_5, window_bounds = array<i64: 1, 4>}, {transform_indices = @transform_6, window_bounds = array<i64: 8, 4>}]} {
    %c0 = arith.constant 0 : index
    %0 = memref.load %arg1[%c0] : memref<1xf32, #tpu.memory_space<smem>>
    %c0_0 = arith.constant 0 : index
    %c0_1 = arith.constant 0 : index
    %1 = vector.load %arg6[%c0_0, %c0_1] : memref<6x256xf32, #tpu.memory_space<vmem>>, vector<6x256xf32>
    %2 = vector.extract_strided_slice %1 {offsets = [0, 0], sizes = [1, 256], strides = [1, 1]} : vector<6x256xf32> to vector<1x256xf32>
    %3 = vector.extract_strided_slice %1 {offsets = [1, 0], sizes = [1, 256], strides = [1, 1]} : vector<6x256xf32> to vector<1x256xf32>
    %4 = vector.extract_strided_slice %1 {offsets = [2, 0], sizes = [1, 256], strides = [1, 1]} : vector<6x256xf32> to vector<1x256xf32>
    %5 = vector.extract_strided_slice %1 {offsets = [3, 0], sizes = [1, 256], strides = [1, 1]} : vector<6x256xf32> to vector<1x256xf32>
    %6 = vector.extract_strided_slice %1 {offsets = [4, 0], sizes = [1, 256], strides = [1, 1]} : vector<6x256xf32> to vector<1x256xf32>
    %7 = vector.extract_strided_slice %1 {offsets = [5, 0], sizes = [1, 256], strides = [1, 1]} : vector<6x256xf32> to vector<1x256xf32>
    %c0_2 = arith.constant 0 : index
    %c0_3 = arith.constant 0 : index
    %8 = vector.load %arg2[%c0_2, %c0_3] : memref<8x16xf32, #tpu.memory_space<vmem>>, vector<8x16xf32>
    %9 = arith.truncf %8 : vector<8x16xf32> to vector<8x16xbf16>
    %c0_4 = arith.constant 0 : index
    %c0_5 = arith.constant 0 : index
    %10 = vector.load %arg3[%c0_4, %c0_5] : memref<16x256xbf16, #tpu.memory_space<vmem>>, vector<16x256xbf16>
    %cst = arith.constant dense<0.000000e+00> : vector<8x256xf32>
    %11 = tpu.matmul %9, %10, %cst {dimension_numbers = #tpu.dot_dimension_numbers<[1], [0], [0], [1], [0, 0, 1, 1], [], []>} : vector<8x16xbf16>, vector<16x256xbf16>, vector<8x256xf32> -> vector<8x256xf32>
    %12 = vector.broadcast %2 : vector<1x256xf32> to vector<8x256xf32>
    %13 = arith.addf %11, %12 : vector<8x256xf32>
    %cst_6 = arith.constant dense<0.000000e+00> : vector<8xf32>
    %14 = vector.multi_reduction <add>, %13, %cst_6 [1] : vector<8x256xf32> to vector<8xf32>
    %15 = vector.shape_cast %14 : vector<8xf32> to vector<8x1xf32>
    %cst_7 = arith.constant 2.560000e+02 : f32
    %16 = vector.broadcast %cst_7 : f32 to vector<8x1xf32>
    %17 = arith.divf %15, %16 : vector<8x1xf32>
    %18 = vector.broadcast %17 : vector<8x1xf32> to vector<8x256xf32>
    %19 = arith.subf %13, %18 : vector<8x256xf32>
    %20 = arith.mulf %19, %19 : vector<8x256xf32>
    %cst_8 = arith.constant dense<0.000000e+00> : vector<8xf32>
    %21 = vector.multi_reduction <add>, %20, %cst_8 [1] : vector<8x256xf32> to vector<8xf32>
    %22 = vector.shape_cast %21 : vector<8xf32> to vector<8x1xf32>
    %cst_9 = arith.constant 2.560000e+02 : f32
    %23 = vector.broadcast %cst_9 : f32 to vector<8x1xf32>
    %24 = arith.divf %22, %23 : vector<8x1xf32>
    %cst_10 = arith.constant 9.99999974E-6 : f32
    %25 = vector.broadcast %cst_10 : f32 to vector<8x1xf32>
    %26 = arith.addf %24, %25 : vector<8x1xf32>
    %27 = math.rsqrt %26 : vector<8x1xf32>
    %28 = vector.broadcast %27 : vector<8x1xf32> to vector<8x256xf32>
    %29 = arith.mulf %19, %28 : vector<8x256xf32>
    %30 = arith.truncf %29 : vector<8x256xf32> to vector<8x256xbf16>
    %31 = arith.truncf %3 : vector<1x256xf32> to vector<1x256xbf16>
    %32 = vector.broadcast %31 : vector<1x256xbf16> to vector<8x256xbf16>
    %33 = arith.mulf %30, %32 : vector<8x256xbf16>
    %34 = arith.truncf %4 : vector<1x256xf32> to vector<1x256xbf16>
    %35 = vector.broadcast %34 : vector<1x256xbf16> to vector<8x256xbf16>
    %36 = arith.addf %33, %35 : vector<8x256xbf16>
    %cst_11 = arith.constant 1.000980e-02 : bf16
    %37 = vector.broadcast %cst_11 : bf16 to vector<8x256xbf16>
    %38 = arith.mulf %37, %36 : vector<8x256xbf16>
    %39 = arith.maximumf %36, %38 : vector<8x256xbf16>
    %c0_12 = arith.constant 0 : index
    %c0_13 = arith.constant 0 : index
    %40 = vector.load %arg4[%c0_12, %c0_13] : memref<256x256xbf16, #tpu.memory_space<vmem>>, vector<256x256xbf16>
    %cst_14 = arith.constant dense<0.000000e+00> : vector<8x256xf32>
    %41 = tpu.matmul %39, %40, %cst_14 {dimension_numbers = #tpu.dot_dimension_numbers<[1], [0], [0], [1], [0, 0, 1, 1], [], []>} : vector<8x256xbf16>, vector<256x256xbf16>, vector<8x256xf32> -> vector<8x256xf32>
    %42 = vector.broadcast %5 : vector<1x256xf32> to vector<8x256xf32>
    %43 = arith.addf %41, %42 : vector<8x256xf32>
    %cst_15 = arith.constant dense<0.000000e+00> : vector<8xf32>
    %44 = vector.multi_reduction <add>, %43, %cst_15 [1] : vector<8x256xf32> to vector<8xf32>
    %45 = vector.shape_cast %44 : vector<8xf32> to vector<8x1xf32>
    %cst_16 = arith.constant 2.560000e+02 : f32
    %46 = vector.broadcast %cst_16 : f32 to vector<8x1xf32>
    %47 = arith.divf %45, %46 : vector<8x1xf32>
    %48 = vector.broadcast %47 : vector<8x1xf32> to vector<8x256xf32>
    %49 = arith.subf %43, %48 : vector<8x256xf32>
    %50 = arith.mulf %49, %49 : vector<8x256xf32>
    %cst_17 = arith.constant dense<0.000000e+00> : vector<8xf32>
    %51 = vector.multi_reduction <add>, %50, %cst_17 [1] : vector<8x256xf32> to vector<8xf32>
    %52 = vector.shape_cast %51 : vector<8xf32> to vector<8x1xf32>
    %cst_18 = arith.constant 2.560000e+02 : f32
    %53 = vector.broadcast %cst_18 : f32 to vector<8x1xf32>
    %54 = arith.divf %52, %53 : vector<8x1xf32>
    %cst_19 = arith.constant 9.99999974E-6 : f32
    %55 = vector.broadcast %cst_19 : f32 to vector<8x1xf32>
    %56 = arith.addf %54, %55 : vector<8x1xf32>
    %57 = math.rsqrt %56 : vector<8x1xf32>
    %58 = vector.broadcast %57 : vector<8x1xf32> to vector<8x256xf32>
    %59 = arith.mulf %49, %58 : vector<8x256xf32>
    %60 = arith.truncf %59 : vector<8x256xf32> to vector<8x256xbf16>
    %61 = arith.truncf %6 : vector<1x256xf32> to vector<1x256xbf16>
    %62 = vector.broadcast %61 : vector<1x256xbf16> to vector<8x256xbf16>
    %63 = arith.mulf %60, %62 : vector<8x256xbf16>
    %64 = arith.truncf %7 : vector<1x256xf32> to vector<1x256xbf16>
    %65 = vector.broadcast %64 : vector<1x256xbf16> to vector<8x256xbf16>
    %66 = arith.addf %63, %65 : vector<8x256xbf16>
    %cst_20 = arith.constant 1.000980e-02 : bf16
    %67 = vector.broadcast %cst_20 : bf16 to vector<8x256xbf16>
    %68 = arith.mulf %67, %66 : vector<8x256xbf16>
    %69 = arith.maximumf %66, %68 : vector<8x256xbf16>
    %c0_21 = arith.constant 0 : index
    %c0_22 = arith.constant 0 : index
    %70 = vector.load %arg5[%c0_21, %c0_22] : memref<256x4xbf16, #tpu.memory_space<vmem>>, vector<256x4xbf16>
    %cst_23 = arith.constant dense<0.000000e+00> : vector<8x4xf32>
    %71 = tpu.matmul %69, %70, %cst_23 {dimension_numbers = #tpu.dot_dimension_numbers<[1], [0], [0], [1], [0, 0, 1, 1], [], []>} : vector<8x256xbf16>, vector<256x4xbf16>, vector<8x4xf32> -> vector<8x4xf32>
    %c0_24 = arith.constant 0 : index
    %c0_25 = arith.constant 0 : index
    %72 = vector.load %arg7[%c0_24, %c0_25] : memref<1x4xf32, #tpu.memory_space<vmem>>, vector<1x4xf32>
    %73 = vector.broadcast %72 : vector<1x4xf32> to vector<8x4xf32>
    %74 = arith.addf %71, %73 : vector<8x4xf32>
    %75 = math.tanh %74 : vector<8x4xf32>
    %76 = vector.broadcast %0 : f32 to vector<8x4xf32>
    %77 = arith.mulf %76, %75 : vector<8x4xf32>
    %c0_26 = arith.constant 0 : index
    %c0_27 = arith.constant 0 : index
    %78 = vector.load %arg8[%c0_26, %c0_27] : memref<8x4xf32, #tpu.memory_space<vmem>>, vector<8x4xf32>
    tpu.vector_store %arg8[%c0_26, %c0_27], %77 {strides = array<i32>} : memref<8x4xf32, #tpu.memory_space<vmem>>, vector<8x4xf32>,
    return
  }
  func.func @transform_0(%arg0: i32, %arg1: memref<1xf32, #tpu.memory_space<smem>>) -> (i32, i32) {
    %c0_i32 = arith.constant 0 : i32
    %c0_i32_0 = arith.constant 0 : i32
    return %arg0, %c0_i32 : i32, i32
  }
  func.func @transform_1(%arg0: i32, %arg1: memref<1xf32, #tpu.memory_space<smem>>) -> (i32, i32) {
    %c0_i32 = arith.constant 0 : i32
    %c0_i32_0 = arith.constant 0 : i32
    %c0_i32_1 = arith.constant 0 : i32
    return %c0_i32, %c0_i32_0 : i32, i32
  }
  func.func @transform_2(%arg0: i32, %arg1: memref<1xf32, #tpu.memory_space<smem>>) -> (i32, i32) {
    %c0_i32 = arith.constant 0 : i32
    %c0_i32_0 = arith.constant 0 : i32
    %c0_i32_1 = arith.constant 0 : i32
    return %c0_i32, %c0_i32_0 : i32, i32
  }
  func.func @transform_3(%arg0: i32, %arg1: memref<1xf32, #tpu.memory_space<smem>>) -> (i32, i32) {
    %c0_i32 = arith.constant 0 : i32
    %c0_i32_0 = arith.constant 0 : i32
    %c0_i32_1 = arith.constant 0 : i32
    return %c0_i32, %c0_i32_0 : i32, i32
  }
  func.func @transform_4(%arg0: i32, %arg1: memref<1xf32, #tpu.memory_space<smem>>) -> (i32, i32) {
    %c0_i32 = arith.constant 0 : i32
    %c0_i32_0 = arith.constant 0 : i32
    %c0_i32_1 = arith.constant 0 : i32
    return %c0_i32, %c0_i32_0 : i32, i32
  }
  func.func @transform_5(%arg0: i32, %arg1: memref<1xf32, #tpu.memory_space<smem>>) -> (i32, i32) {
    %c0_i32 = arith.constant 0 : i32
    %c0_i32_0 = arith.constant 0 : i32
    %c0_i32_1 = arith.constant 0 : i32
    return %c0_i32, %c0_i32_0 : i32, i32
  }
  func.func @transform_6(%arg0: i32, %arg1: memref<1xf32, #tpu.memory_space<smem>>) -> (i32, i32) {
    %c0_i32 = arith.constant 0 : i32
    %c0_i32_0 = arith.constant 0 : i32
    return %arg0, %c0_i32 : i32, i32
  }
}

</mosaic_0001>

<bundles_post_ra>
// kernel: tpu_custom_call.1
= control target key start
LH: loop header
LB: loop body
LE: loop exit
PB: predicated region body
PF: predicated region fallthrough
CT: control target
= control target key end

     0   :  { %13 = vsyncpa [#allocation5], 0  ;;  %s811_s24 = smov [#allocation4]   ;;  %s979_s0 = inlined_call_operand.<no memory space> [shape: f32[1], index: 0, kind: input, shape index: {}]   ;;  %s980_s1 = inlined_call_operand.vmem [shape: f32[8,16], index: 1, kind: input, shape index: {}]   ;;  %s981_s2 = inlined_call_operand.vmem [shape: bf16[16,256], index: 2, kind: input, shape index: {}]   ;;  %s982_s3 = inlined_call_operand.hbm [shape: bf16[256,256], index: 3, kind: input, shape index: {}]   ;;  %s983_s4 = inlined_call_operand.vmem [shape: bf16[256,4], index: 4, kind: input, shape index: {}]   ;;  %s984_s5 = inlined_call_operand.vmem [shape: f32[6,256], index: 5, kind: input, shape index: {}]   ;;  %s985_s6 = inlined_call_operand.vmem [shape: f32[1,4], index: 6, kind: input, shape index: {}]   ;;  %s986_s7 = inlined_call_operand.vmem [shape: f32[8,4], index: 7, kind: output, shape index: {}]  }
   0x1   :  { %s23_s25 = sshll.u32 %s811_s24, 4  ;;  %s787_s28 = scalar_lea.hbm %s982_s3, 4096  ;;  %s24_s25 = int_to_ptr.vmem [resolvable:$true] %s23_s25 }
   0x2   :  { %p788_p0 = scmp.ne.s32.totalorder %s982_s3, %s787_s28  ;;  %p791_p1 = scmp.lt.u32.totalorder %s787_s28, %s982_s3 }
   0x4   :  { %p793_p2 = pnand %p791_p1, %p788_p0 }
   0x6   :  { %796 = shalt.err (!%p793_p2)
}
   0x7   :  { %s797_s10 = scalar_lea.vmem %s24_s25, 4096  ;;  %p802_p4 = scmp.lt.s32.totalorder %s24_s25, %s24_s25 }
   0x8   :  { %p798_p3 = scmp.ne.s32.totalorder %s24_s25, %s797_s10  ;;  %p803_p5 = scmp.lt.s32.totalorder %s797_s10, %s797_s10 }
   0xa   :  { %p804_p6 = por %p803_p5, %p802_p4 }
   0xc   :  { %p805_p7 = pnand %p804_p6, %p798_p3 }
   0xe   :  { %808 = shalt.err (!%p805_p7)
}
   0xf   :  { %s812_s11 = smov 128   ;;  %s813_s12 = smov 8  }
  0x10   :  { %29 = dma.hbm_to_vmem [thread:$0]  %s982_s3, 4096, %s24_s25, [#allocation5], %s812_s11, %s812_s11, %s813_s12  }
  0x11   :  { %809 = dma.done.wait [#allocation5], 4096  }
  0x12   :  { %810 = vsyncadd [#allocation5], 4294963200  ;;  %v814_v0 = vmov 0   ;;  %v714_v1 = vld [vmem:[%s981_s2 + $0x4] ss:$8 sps:$4 sm:$0xff]   ;;  %vm66_vm0 = vcmask 130048   ;;  %v48_v5 = vlaneseq }
  0x13   :  { %102 = vmatprep.mubr.bf16.mxu0 %v814_v0  ;;  %v716_v2 = vld [vmem:[%s981_s2] ss:$8 sps:$4 sm:$0xff]   ;;  %70 = vmatprep.subr.bf16.mxu0 %v714_v1  ;;  %v717_v19 = vld [vmem:[#allocation4 + $0x4] ss:$8 sps:$4 sm:$0xff]   ;;  %v720_v21 = vld [vmem:[#allocation4 + $0x14] ss:$8 sps:$4 sm:$0xff]  }
  0x14   :  { %v44_v3 = vld [vmem:[%s980_s1] sm:$0xff]  ;;  %71 = vmatpush1.bf16.msra.mxu0 %v716_v2  ;;  %v876_v6 = vshrl.u32 %v48_v5, 7  ;;  %v889_v9 = vld [vmem:[%s984_s5 + $0x8] sm:$0x3f]  ;;  %368 = vmatprep.subr.bf16.mxu1 %v717_v19  ;;  %v722_v22 = vld [vmem:[#allocation4 + $0x10] ss:$8 sps:$4 sm:$0xff]  }
  0x15   :  { %v45_v4 = vpack.c.bf16 %v44_v3, %v44_v3  ;;  %v884_v8 = vld [vmem:[%s984_s5] sm:$0x3f]  ;;  %v726_v25 = vld [vmem:[#allocation4 + $0x34] ss:$8 sps:$4 sm:$0xff]   ;;  %v728_v26 = vld [vmem:[#allocation4 + $0x30] ss:$8 sps:$4 sm:$0xff]   ;;  %v131_v62 = vpack.c.bf16 %v889_v9, %v889_v9 }
  0x16   :  { %v879_v7 = vsub.s32 0, %v876_v6  ;;  %v719_v20 = vld [vmem:[#allocation4] ss:$8 sps:$4 sm:$0xff]   ;;  %v723_v23 = vld [vmem:[#allocation4 + $0x24] ss:$8 sps:$4 sm:$0xff]   ;;  %v130_v61 = vpack.c.bf16 %v884_v8, %v884_v8  ;;  %vm629_vm1 = vcmask 31744  }
  0x17   :  { %638 = vmatmul.mubr.msk.bf16.vlgmr.msra.gmra.mrb[0].mxu0 %vm66_vm0, %v45_v4  ;;  %369 = vmatpush1.bf16.msra.mxu1 %v719_v20  ;;  %v725_v24 = vld [vmem:[#allocation4 + $0x20] ss:$8 sps:$4 sm:$0xff]   ;;  %v729_v27 = vld [vmem:[#allocation4 + $0x44] ss:$8 sps:$4 sm:$0xff]   ;;  %v732_v29 = vld [vmem:[#allocation4 + $0x54] ss:$8 sps:$4 sm:$0xff]   ;;  %v906_v5 = vpack.i.b16 %v131_v62, %v131_v62 }
  0x18   :  { %v51_v10 = vrot.slane %v884_v8, %v879_v7  ;;  %v55_v11 = vrot.slane %v889_v9, %v879_v7  ;;  %370 = vmatprep.subr.bf16.mxu1 %v720_v21  ;;  %v731_v28 = vld [vmem:[#allocation4 + $0x40] ss:$8 sps:$4 sm:$0xff]   ;;  %v734_v30 = vld [vmem:[#allocation4 + $0x50] ss:$8 sps:$4 sm:$0xff]   ;;  %v735_v31 = vld [vmem:[#allocation4 + $0x64] ss:$8 sps:$4 sm:$0xff]   ;;  %v903_v3 = vpack.i.b16 %v130_v61, %v130_v61 }
  0x19   :  { %v737_v32 = vld [vmem:[#allocation4 + $0x60] ss:$8 sps:$4 sm:$0xff]   ;;  %v738_v33 = vld [vmem:[#allocation4 + $0x74] ss:$8 sps:$4 sm:$0xff]   ;;  %v740_v34 = vld [vmem:[#allocation4 + $0x70] ss:$8 sps:$4 sm:$0xff]  }
  0x1a   :  { %v741_v35 = vld [vmem:[#allocation4 + $0x84] ss:$8 sps:$4 sm:$0xff]   ;;  %v743_v36 = vld [vmem:[#allocation4 + $0x80] ss:$8 sps:$4 sm:$0xff]   ;;  %v744_v44 = vld [vmem:[#allocation4 + $0x94] ss:$8 sps:$4 sm:$0xff]  }
  0x1b   :  { %371 = vmatpush1.bf16.msra.mxu1 %v722_v22  ;;  %v746_v45 = vld [vmem:[#allocation4 + $0x90] ss:$8 sps:$4 sm:$0xff]   ;;  %v747_v46 = vld [vmem:[#allocation4 + $0xa4] ss:$8 sps:$4 sm:$0xff]   ;;  %v749_v47 = vld [vmem:[#allocation4 + $0xa0] ss:$8 sps:$4 sm:$0xff]  }
  0x1c   :  { %372 = vmatprep.subr.bf16.mxu1 %v723_v23  ;;  %v750_v48 = vld [vmem:[#allocation4 + $0xb4] ss:$8 sps:$4 sm:$0xff]   ;;  %v752_v49 = vld [vmem:[#allocation4 + $0xb0] ss:$8 sps:$4 sm:$0xff]   ;;  %v753_v50 = vld [vmem:[#allocation4 + $0xc4] ss:$8 sps:$4 sm:$0xff]  }
  0x1d   :  { %v755_v51 = vld [vmem:[#allocation4 + $0xc0] ss:$8 sps:$4 sm:$0xff]   ;;  %v756_v52 = vld [vmem:[#allocation4 + $0xd4] ss:$8 sps:$4 sm:$0xff]   ;;  %v758_v53 = vld [vmem:[#allocation4 + $0xd0] ss:$8 sps:$4 sm:$0xff]  }
  0x1e   :  { %v759_v54 = vld [vmem:[#allocation4 + $0xe4] ss:$8 sps:$4 sm:$0xff]   ;;  %v761_v55 = vld [vmem:[#allocation4 + $0xe0] ss:$8 sps:$4 sm:$0xff]   ;;  %v762_v56 = vld [vmem:[#allocation4 + $0xf4] ss:$8 sps:$4 sm:$0xff]  }
  0x1f   :  { %373 = vmatpush1.bf16.msra.mxu1 %v725_v24  ;;  %v764_v57 = vld [vmem:[#allocation4 + $0xf0] ss:$8 sps:$4 sm:$0xff]   ;;  %v133_v63 = vshrl.u32 %v130_v61, 16  ;;  %v141_v0 = vshrl.u32 %v131_v62, 16  ;;  %v154_v4 = vsub.s32 1, %v876_v6 }
  0x20   :  { %374 = vmatprep.subr.bf16.mxu1 %v726_v25 }
  0x21   :  { %v899_v1 = vpack.i.b16 %v133_v63, %v133_v63  ;;  %v901_v2 = vpack.i.b16 %v141_v0, %v141_v0 }
  0x23   :  { %375 = vmatpush1.bf16.msra.mxu1 %v728_v26 }
  0x24   :  { %376 = vmatprep.subr.bf16.mxu1 %v729_v27  ;;  %v202_v27 = vsub.s32 3, %v876_v6 }
  0x27   :  { %377 = vmatpush1.bf16.msra.mxu1 %v731_v28  ;;  %v207_v28 = vrot.slane %v889_v9, %v202_v27 }
  0x28   :  { %378 = vmatprep.subr.bf16.mxu1 %v732_v29 }
  0x2b   :  { %379 = vmatpush1.bf16.msra.mxu1 %v734_v30 }
  0x2c   :  { %380 = vmatprep.subr.bf16.mxu1 %v735_v31 }
  0x2f   :  { %381 = vmatpush1.bf16.msra.mxu1 %v737_v32 }
  0x30   :  { %382 = vmatprep.subr.bf16.mxu1 %v738_v33 }
  0x33   :  { %383 = vmatpush1.bf16.msra.mxu1 %v740_v34 }
  0x34   :  { %384 = vmatprep.subr.bf16.mxu1 %v741_v35 }
  0x37   :  { %385 = vmatpush1.bf16.msra.mxu1 %v743_v36  ;;  %v765_v36 = vld [vmem:[%s983_s4 + $0x40] sm:$0xff]  }
  0x38   :  { %386 = vmatprep.subr.bf16.mxu1 %v744_v44  ;;  %688 = vmatprep.subr.bf16.mxu0 %v765_v36  ;;  %v768_v44 = vld [vmem:[%s983_s4 + $0x8] sm:$0xff]  }
  0x3b   :  { %387 = vmatpush1.bf16.msra.mxu1 %v746_v45  ;;  %v769_v45 = vld [vmem:[%s983_s4 + $0x50] sm:$0xff]  }
  0x3c   :  { %388 = vmatprep.subr.bf16.mxu1 %v747_v46  ;;  %v770_v46 = vld [vmem:[%s983_s4 + $0x10] sm:$0xff]  }
  0x3f   :  { %389 = vmatpush1.bf16.msra.mxu1 %v749_v47  ;;  %v771_v47 = vld [vmem:[%s983_s4 + $0x58] sm:$0xff]  }
  0x40   :  { %390 = vmatprep.subr.bf16.mxu1 %v750_v48  ;;  %v772_v48 = vld [vmem:[%s983_s4 + $0x18] sm:$0xff]  }
  0x43   :  { %391 = vmatpush1.bf16.msra.mxu1 %v752_v49  ;;  %v773_v49 = vld [vmem:[%s983_s4 + $0x60] sm:$0xff]  }
  0x44   :  { %392 = vmatprep.subr.bf16.mxu1 %v753_v50  ;;  %v774_v50 = vld [vmem:[%s983_s4 + $0x20] sm:$0xff]  }
  0x47   :  { %393 = vmatpush1.bf16.msra.mxu1 %v755_v51  ;;  %v775_v51 = vld [vmem:[%s983_s4 + $0x68] sm:$0xff]  }
  0x48   :  { %394 = vmatprep.subr.bf16.mxu1 %v756_v52  ;;  %v776_v52 = vld [vmem:[%s983_s4 + $0x28] sm:$0xff]  }
  0x4b   :  { %395 = vmatpush1.bf16.msra.mxu1 %v758_v53  ;;  %v777_v53 = vld [vmem:[%s983_s4 + $0x70] sm:$0xff]  }
  0x4c   :  { %396 = vmatprep.subr.bf16.mxu1 %v759_v54  ;;  %v778_v54 = vld [vmem:[%s983_s4 + $0x30] sm:$0xff]  }
  0x4f   :  { %397 = vmatpush1.bf16.msra.mxu1 %v761_v55  ;;  %v779_v55 = vld [vmem:[%s983_s4 + $0x78] sm:$0xff]  }
  0x50   :  { %398 = vmatprep.subr.bf16.mxu1 %v762_v56  ;;  %v780_v56 = vld [vmem:[%s983_s4 + $0x38] sm:$0xff]  }
  0x53   :  { %399 = vmatpush1.bf16.msra.mxu1 %v764_v57 }
  0xea   :  { %v104_v12 = vpop.f32.mrb[0].mxu0 }
  0xeb   :  { %v105_v13 = vadd.f32 %v104_v12, %v51_v10  ;;  %v106_v14 = vpop.f32.mrb[1].mxu0  ;;  %v147_v12 = vrot.slane %v901_v2, %v879_v7 }
  0xec   :  { %v107_v15 = vadd.f32 %v106_v14, %v55_v11  ;;  %v108_v16 = vpop.f32.mrb[2].mxu0  ;;  %v139_v14 = vrot.slane %v899_v1, %v879_v7  ;;  %v203_v7 = vrot.slane %v884_v8, %v202_v27 }
  0xed   :  { %v109_v17 = vpop.f32.mrb[3].mxu0  ;;  %v161_v16 = vrot.slane %v906_v5, %v154_v4 }
  0xee   :  { %v111_v18 = vadd.f32 %v107_v15, %v105_v13 }
  0xf0   :  { %112 = vadd.xlane.f32.xlu0 %v111_v18  ;;  %v155_v18 = vrot.slane %v903_v3, %v154_v4 }
 0x17d   :  { %v113_v37 = vpop.xlane.xlu0 %112 }
 0x17e   :  { %v115_v38 = vmul.f32 0.00390625, %v113_v37  ;;  %v766_v37 = vld [vmem:[%s983_s4] sm:$0xff]  }
 0x17f   :  { %689 = vmatpush3.bf16.msra.mxu0 %v766_v37 }
 0x180   :  { %v116_v39 = vsub.f32 %v105_v13, %v115_v38  ;;  %v117_v40 = vsub.f32 %v107_v15, %v115_v38 }
 0x182   :  { %v118_v41 = vmul.f32 %v116_v39, %v116_v39  ;;  %v119_v42 = vmul.f32 %v117_v40, %v117_v40 }
 0x184   :  { %v120_v43 = vadd.f32 %v119_v42, %v118_v41 }
 0x186   :  { %121 = vadd.xlane.f32.xlu0 %v120_v43  ;;  %v767_v43 = vld [vmem:[%s983_s4 + $0x48] sm:$0xff]  }
 0x187   :  { %690 = vmatprep.subr.bf16.mxu0 %v767_v43 }
 0x188   :  { %691 = vmatpush3.bf16.msra.mxu0 %v768_v44 }
 0x189   :  { %692 = vmatprep.subr.bf16.mxu0 %v769_v45 }
 0x18c   :  { %693 = vmatpush3.bf16.msra.mxu0 %v770_v46 }
 0x18d   :  { %694 = vmatprep.subr.bf16.mxu0 %v771_v47 }
 0x190   :  { %695 = vmatpush3.bf16.msra.mxu0 %v772_v48 }
 0x191   :  { %696 = vmatprep.subr.bf16.mxu0 %v773_v49 }
 0x194   :  { %697 = vmatpush3.bf16.msra.mxu0 %v774_v50 }
 0x195   :  { %698 = vmatprep.subr.bf16.mxu0 %v775_v51 }
 0x198   :  { %699 = vmatpush3.bf16.msra.mxu0 %v776_v52 }
 0x199   :  { %700 = vmatprep.subr.bf16.mxu0 %v777_v53 }
 0x19c   :  { %701 = vmatpush3.bf16.msra.mxu0 %v778_v54 }
 0x19d   :  { %702 = vmatprep.subr.bf16.mxu0 %v779_v55 }
 0x1a0   :  { %703 = vmatpush3.bf16.msra.mxu0 %v780_v56 }
 0x213   :  { %v122_v58 = vpop.xlane.xlu0 %121 }
 0x214   :  { %v123_v59 = vmul.f32 0.00390625, %v122_v58 }
 0x216   :  { %v124_v60 = vadd.f32 1e-05, %v123_v59 }
 0x218   :  { %781 = vrsqrt.f32 %v124_v60  ;;  %v429_v60 = vsub.s32 2, %v876_v6 }
 0x21a   :  { %v430_v62 = vrot.slane %v903_v3, %v429_v60  ;;  %v434_v63 = vrot.slane %v906_v5, %v429_v60  ;;  %v671_v5 = vld [vmem:[%s985_s6] ss:$0 sm:$0xff] }
 0x222   :  { %v782_v10 = vpop.eup %781 }
 0x223   :  { %v127_v11 = vmul.f32 %v782_v10, %v117_v40  ;;  %v126_v13 = vmul.f32 %v782_v10, %v116_v39 }
 0x225   :  { %v129_v15 = vpack.c.bf16 %v127_v11, %v127_v11  ;;  %v128_v17 = vpack.c.bf16 %v126_v13, %v126_v13  ;;  %v440_v13 = vrot.slane %v899_v1, %v429_v60 }
 0x227   :  { %v149_v19 = vmul.bf16 %v147_v12, %v129_v15  ;;  %v148_v20 = vmul.bf16 %v139_v14, %v128_v17  ;;  %v444_v12 = vrot.slane %v901_v2, %v429_v60 }
 0x229   :  { %v163_v21 = vadd.bf16 %v161_v16, %v149_v19  ;;  %v162_v22 = vadd.bf16 %v155_v18, %v148_v20 }
 0x22b   :  { %v165_v23 = vmul.bf16 1009007652, %v163_v21  ;;  %v164_v24 = vmul.bf16 1009007652, %v162_v22 }
 0x22d   :  { %v167_v25 = vmax.bf16 %v165_v23, %v163_v21  ;;  %v166_v26 = vmax.bf16 %v164_v24, %v162_v22  ;;  %v627_v24 = vstv %s979_s0 }
 0x22f   :  { %400 = vmatprep.mubr.bf16.mxu1 %v167_v25 }
 0x230   :  { %401 = vmatmul.mubr.bf16.vlgmr.msra.gmra.mrb[0].mxu1 %v166_v26 }
 0x303   :  { %v402_v29 = vpop.f32.mrb[0].mxu1 }
 0x304   :  { %v403_v30 = vadd.f32 %v402_v29, %v203_v7  ;;  %v404_v31 = vpop.f32.mrb[1].mxu1 }
 0x305   :  { %v405_v32 = vadd.f32 %v404_v31, %v207_v28  ;;  %v406_v33 = vpop.f32.mrb[2].mxu1 }
 0x306   :  { %v407_v34 = vpop.f32.mrb[3].mxu1 }
 0x307   :  { %v409_v35 = vadd.f32 %v405_v32, %v403_v30 }
 0x309   :  { %410 = vadd.xlane.f32.xlu1 %v409_v35 }
 0x396   :  { %v411_v8 = vpop.xlane.xlu1 %410 }
 0x397   :  { %v412_v9 = vmul.f32 0.00390625, %v411_v8 }
 0x399   :  { %v413_v38 = vsub.f32 %v403_v30, %v412_v9  ;;  %v414_v39 = vsub.f32 %v405_v32, %v412_v9 }
 0x39b   :  { %v415_v40 = vmul.f32 %v413_v38, %v413_v38  ;;  %v416_v41 = vmul.f32 %v414_v39, %v414_v39 }
 0x39d   :  { %v417_v42 = vadd.f32 %v416_v41, %v415_v40 }
 0x39f   :  { %418 = vadd.xlane.f32.xlu1 %v417_v42 }
 0x42c   :  { %v419_v57 = vpop.xlane.xlu1 %418 }
 0x42d   :  { %v420_v58 = vmul.f32 0.00390625, %v419_v57 }
 0x42f   :  { %v421_v59 = vadd.f32 1e-05, %v420_v58 }
 0x431   :  { %783 = vrsqrt.f32 %v421_v59 }
 0x43b   :  { %v784_v61 = vpop.eup %783 }
 0x43c   :  { %v423_v0 = vmul.f32 %v784_v61, %v413_v38  ;;  %v424_v4 = vmul.f32 %v784_v61, %v414_v39 }
 0x43e   :  { %v425_v10 = vpack.c.bf16 %v423_v0, %v423_v0  ;;  %v426_v11 = vpack.c.bf16 %v424_v4, %v424_v4 }
 0x440   :  { %v436_v14 = vmul.bf16 %v434_v63, %v426_v11  ;;  %v435_v15 = vmul.bf16 %v430_v62, %v425_v10 }
 0x442   :  { %v446_v16 = vadd.bf16 %v444_v12, %v436_v14  ;;  %v445_v17 = vadd.bf16 %v440_v13, %v435_v15 }
 0x444   :  { %v448_v18 = vmul.bf16 1009007652, %v446_v16  ;;  %v447_v19 = vmul.bf16 1009007652, %v445_v17 }
 0x446   :  { %v450_v6 = vmax.bf16 %v448_v18, %v446_v16  ;;  %v449_v20 = vmax.bf16 %v447_v19, %v445_v17 }
 0x448   :  { %618 = vmatprep.mubr.bf16.mxu0 %v450_v6 }
 0x449   :  { %619 = vmatmul.mubr.bf16.vlgmr.msra.gmra.mrb[4].mxu0 %v449_v20 }
 0x51c   :  { %v704_v3 = vpop.f32.mrb[4].mxu0 }
 0x51d   :  { %v705_v21 = vpop.f32.mrb[5].mxu0 }
 0x51e   :  { %v706_v22 = vadd.f32 %v705_v21, %v704_v3  ;;  %v707_v2 = vpop.f32.mrb[6].mxu0 }
 0x51f   :  { %v708_v23 = vpop.f32.mrb[7].mxu0 }
 0x520   :  { %v621_v1 = vadd.f32 %v706_v22, %v671_v5 }
 0x522   :  { %785 = vtanh.f32 %v621_v1 }
 0x52c   :  { %v786_v25 = vpop.eup %785 }
 0x52d   :  { %v628_v26 = vmul.f32 %v786_v25, %v627_v24 }
 0x52f   :  { %630 = vst.msk [vmem:[%s986_s7] sm:$0xff] %vm629_vm1, %v628_v26 }
 0x530   :  { %635 = vsyncpa [#allocation5], 1 }

</bundles_post_ra>
